<compile_context>
chip_gen: v7x
topology: tpu7x:2x2x1
jax: 0.10.0
libtpu: 0.0.40
codegen_flags: <defaults>
</compile_context>

<pallas_src>
import functools

import numpy as np
import jax
import jax.numpy as jnp
from jax.experimental import pallas as pl
from jax.experimental.pallas import tpu as pltpu


# ----------------------------------------------------------------------------
# Helpers
# ----------------------------------------------------------------------------
def _stable_sigmoid(x):
    # sigmoid(x) = 0.5 * (tanh(x/2) + 1)  -- overflow-free, runs on the EUP.
    return 0.5 * (jnp.tanh(0.5 * x) + 1.0)


def _adaptive_pool_matrix(in_size, out_size=4):
    """P[i, h] = 1/|bin_i| if h in bin_i else 0  (PyTorch AdaptiveAvgPool2d bins)."""
    P = np.zeros((out_size, in_size), np.float32)
    for i in range(out_size):
        s = (i * in_size) // out_size
        e = -(-((i + 1) * in_size) // out_size)  # ceil
        P[i, s:e] = 1.0 / float(e - s)
    return P


def _fold_pool_into_conv(w1_pt, H, W):
    """Fold AdaptiveAvgPool2d(4) into the 4x4 conv weight.

    w1_pt: (C_out, C_in, 4, 4)  ->  (C_in*H*W, C_out) effective matmul weight
    so that  gate_preact = feat_small.reshape(B, C_in*H*W) @ W_eff .
    """
    Ph = jnp.asarray(_adaptive_pool_matrix(H, 4))
    Pw = jnp.asarray(_adaptive_pool_matrix(W, 4))
    w_eff = jnp.einsum("ocij,ih,jw->ochw", w1_pt, Ph, Pw)
    return w_eff.reshape(w1_pt.shape[0], -1).T  # (C_in*H*W, C_out)


def _spatial_tile(hw, max_ts=16384):
    """Largest lane-dense tile (multiple of 128) dividing hw, capped at max_ts."""
    if hw <= max_ts:
        return hw
    ts = (max_ts // 128) * 128
    while ts >= 128:
        if hw % ts == 0:
            return ts
        ts -= 128
    return hw


# ----------------------------------------------------------------------------
# Pallas kernels
# ----------------------------------------------------------------------------
def _gate_kernel(x_ref, w1_ref, w2_ref, g_ref):
    """Fused: (pool-folded) conv4x4 -> Swish -> conv1x1 -> Sigmoid."""
    a = jnp.dot(x_ref[...], w1_ref[...], preferred_element_type=jnp.float32)
    s = a * _stable_sigmoid(a)                                   # Swish
    b = jnp.dot(s, w2_ref[...], preferred_element_type=jnp.float32)
    g_ref[...] = _stable_sigmoid(b)                              # Sigmoid


def _scale_kernel(fb_ref, g_ref, o_ref):
    """feat_big block (C, TS) scaled by per-channel gate block (C, 1)."""
    o_ref[...] = fb_ref[...] * g_ref[...]


# ----------------------------------------------------------------------------
# SEBlock forward (Pallas)
# ----------------------------------------------------------------------------
def se_gate(feat_small, w1_pt, w2_pt):
    """Compute the (B, C_out) excitation gate in one fused Pallas kernel."""
    B, C_in, H, W = feat_small.shape
    C_out = w1_pt.shape[0]
    K = C_in * H * W

    x2 = feat_small.reshape(B, K).astype(jnp.float32)
    # Pad batch rows up to a full sublane group (multiple of 8).
    Bp = ((max(B, 8) + 7) // 8) * 8
    if Bp != B:
        x2 = jnp.pad(x2, ((0, Bp - B), (0, 0)))

    w1m = _fold_pool_into_conv(w1_pt, H, W)          # (K, C_out)
    w2m = jnp.transpose(w2_pt[:, :, 0, 0])           # (C_out, C_out)

    gate = pl.pallas_call(
        _gate_kernel,
        out_shape=jax.ShapeDtypeStruct((Bp, C_out), jnp.float32),
    )(x2, w1m, w2m)
    return gate[:B]


def se_apply(feat_big, gate):
    """feat_big * gate (broadcast over H, W) as one lane-dense Pallas pass."""
    B, C, H, W = feat_big.shape
    assert gate.shape == (B, C), (gate.shape, (B, C))
    HW = H * W
    TS = _spatial_tile(HW)
    assert HW % TS == 0

    fb = feat_big.reshape(B, C, HW)                  # NCHW kept; lane dim = H*W
    g3 = gate.astype(feat_big.dtype).reshape(B, C, 1)

    out = pl.pallas_call(
        _scale_kernel,
        out_shape=jax.ShapeDtypeStruct((B, C, HW), feat_big.dtype),
        grid=(B, HW // TS),
        in_specs=[pl.BlockSpec((None, C, TS), lambda b, s: (b, 0, s)),
                  pl.BlockSpec((None, C, 1), lambda b, s: (b, 0, 0))],
        out_specs=pl.BlockSpec((None, C, TS), lambda b, s: (b, 0, s)),
        compiler_params=pltpu.CompilerParams(
            dimension_semantics=("parallel", "parallel")),
    )(fb, g3)
    return out.reshape(B, C, H, W)


@functools.partial(jax.jit, static_argnames=())
def se_block_forward(params, feat_small, feat_big):
    gate = se_gate(feat_small, params["w1"], params["w2"])
    return se_apply(feat_big, gate)


# ----------------------------------------------------------------------------
# Pure-JAX reference (for correctness check)
# ----------------------------------------------------------------------------
def se_block_reference(params, feat_small, feat_big):
    B, C_in, H, W = feat_small.shape
    Ph = jnp.asarray(_adaptive_pool_matrix(H, 4))
    Pw = jnp.asarray(_adaptive_pool_matrix(W, 4))
    pooled = jnp.einsum("bchw,ih,jw->bcij", feat_small, Ph, Pw)
    a = jnp.einsum("bcij,ocij->bo", pooled, params["w1"])
    s = a * jax.nn.sigmoid(a)
    g = jax.nn.sigmoid(jnp.einsum("bo,po->bp", s, params["w2"][:, :, 0, 0]))
    return feat_big * g[:, :, None, None]


# ----------------------------------------------------------------------------
# Parameter init (deterministic, synthetic; spectral_norm via power iteration)
# ----------------------------------------------------------------------------
def spectral_normalize(w, dim, key, n_iter=3, eps=1e-12):
    perm = (dim,) + tuple(i for i in range(w.ndim) if i != dim)
    wm = jnp.transpose(w, perm).reshape(w.shape[dim], -1)
    u = jax.random.normal(key, (wm.shape[0],), jnp.float32)
    u = u / (jnp.linalg.norm(u) + eps)
    v = None
    for _ in range(n_iter):
        v = wm.T @ u
        v = v / (jnp.linalg.norm(v) + eps)
        u = wm @ v
        u = u / (jnp.linalg.norm(u) + eps)
    sigma = u @ (wm @ v)
    return w / sigma


def init_params(key, ch_in, ch_out):
    k1, k2, k3, k4 = jax.random.split(key, 4)
    w1 = jax.random.normal(k1, (ch_out, ch_in, 4, 4), jnp.float32) * 0.1
    w1 = spectral_normalize(w1, dim=0, key=k2)
    w2 = jax.random.normal(k3, (ch_out, ch_out, 1, 1), jnp.float32) * 0.1
    w2 = spectral_normalize(w2, dim=0, key=k4)
    return dict(w1=w1, w2=w2)


# ----------------------------------------------------------------------------
if __name__ == "__main__":
    root = jax.random.PRNGKey(0)
    k_param, k_small, k_big = jax.random.split(root, 3)

    BATCH, CH_IN, CH_OUT = 2, 8, 16
    H_SMALL, H_BIG = 16, 32

    params = init_params(k_param, CH_IN, CH_OUT)
    feat_small = jax.random.normal(k_small, (BATCH, CH_IN, H_SMALL, H_SMALL),
                                   jnp.float32)
    feat_big = jax.random.normal(k_big, (BATCH, CH_OUT, H_BIG, H_BIG),
                                 jnp.float32)

    out = se_block_forward(params, feat_small, feat_big)
    out = jax.block_until_ready(out)

    ref = se_block_reference(params, feat_small, feat_big)
    assert out.shape == feat_big.shape
    assert bool(jnp.all(jnp.isfinite(out)))
    assert bool(jnp.allclose(out, ref, atol=5e-2, rtol=5e-2))

    print("KERNEL_OK")
</pallas_src>

<mosaic_0001>
module attributes {stable_mosaic.version = 11 : i64} {
  func.func @_gate_kernel(%arg0: memref<8x2048xf32, #tpu.memory_space<vmem>>, %arg1: memref<2048x16xf32, #tpu.memory_space<vmem>>, %arg2: memref<16x16xf32, #tpu.memory_space<vmem>>, %arg3: memref<8x16xf32, #tpu.memory_space<vmem>>) attributes {dimension_semantics = [], scalar_prefetch = 0 : i64, scratch_operands = 0 : i64, tpu.core_type = #tpu.core_type<tc>} {
    %c0 = arith.constant 0 : index
    %c0_0 = arith.constant 0 : index
    %0 = vector.load %arg0[%c0, %c0_0] : memref<8x2048xf32, #tpu.memory_space<vmem>>, vector<8x2048xf32>
    %c0_1 = arith.constant 0 : index
    %c0_2 = arith.constant 0 : index
    %1 = vector.load %arg1[%c0_1, %c0_2] : memref<2048x16xf32, #tpu.memory_space<vmem>>, vector<2048x16xf32>
    %cst = arith.constant dense<0.000000e+00> : vector<8x16xf32>
    %2 = tpu.matmul %0, %1, %cst {dimension_numbers = #tpu.dot_dimension_numbers<[1], [0], [0], [1], [0, 0, 1, 1], [], []>} : vector<8x2048xf32>, vector<2048x16xf32>, vector<8x16xf32> -> vector<8x16xf32>
    %cst_3 = arith.constant 5.000000e-01 : f32
    %3 = vector.broadcast %cst_3 : f32 to vector<8x16xf32>
    %4 = arith.mulf %3, %2 : vector<8x16xf32>
    %5 = math.tanh %4 : vector<8x16xf32>
    %cst_4 = arith.constant 1.000000e+00 : f32
    %6 = vector.broadcast %cst_4 : f32 to vector<8x16xf32>
    %7 = arith.addf %5, %6 : vector<8x16xf32>
    %cst_5 = arith.constant 5.000000e-01 : f32
    %8 = vector.broadcast %cst_5 : f32 to vector<8x16xf32>
    %9 = arith.mulf %8, %7 : vector<8x16xf32>
    %10 = arith.mulf %2, %9 : vector<8x16xf32>
    %c0_6 = arith.constant 0 : index
    %c0_7 = arith.constant 0 : index
    %11 = vector.load %arg2[%c0_6, %c0_7] : memref<16x16xf32, #tpu.memory_space<vmem>>, vector<16x16xf32>
    %cst_8 = arith.constant dense<0.000000e+00> : vector<8x16xf32>
    %12 = tpu.matmul %10, %11, %cst_8 {dimension_numbers = #tpu.dot_dimension_numbers<[1], [0], [0], [1], [0, 0, 1, 1], [], []>} : vector<8x16xf32>, vector<16x16xf32>, vector<8x16xf32> -> vector<8x16xf32>
    %cst_9 = arith.constant 5.000000e-01 : f32
    %13 = vector.broadcast %cst_9 : f32 to vector<8x16xf32>
    %14 = arith.mulf %13, %12 : vector<8x16xf32>
    %15 = math.tanh %14 : vector<8x16xf32>
    %cst_10 = arith.constant 1.000000e+00 : f32
    %16 = vector.broadcast %cst_10 : f32 to vector<8x16xf32>
    %17 = arith.addf %15, %16 : vector<8x16xf32>
    %cst_11 = arith.constant 5.000000e-01 : f32
    %18 = vector.broadcast %cst_11 : f32 to vector<8x16xf32>
    %19 = arith.mulf %18, %17 : vector<8x16xf32>
    %c0_12 = arith.constant 0 : index
    %c0_13 = arith.constant 0 : index
    %20 = vector.load %arg3[%c0_12, %c0_13] : memref<8x16xf32, #tpu.memory_space<vmem>>, vector<8x16xf32>
    tpu.vector_store %arg3[%c0_12, %c0_13], %19 {strides = array<i32>} : memref<8x16xf32, #tpu.memory_space<vmem>>, vector<8x16xf32>,
    return
  }
}

module attributes {stable_mosaic.version = 11 : i64} {
  func.func @_scale_kernel(%arg0: i32, %arg1: i32, %arg2: memref<1x16x1024xf32, #tpu.memory_space<vmem>>, %arg3: memref<1x16x1xf32, #tpu.memory_space<vmem>>, %arg4: memref<1x16x1024xf32, #tpu.memory_space<vmem>>) attributes {dimension_semantics = [#tpu.dimension_semantics<parallel>, #tpu.dimension_semantics<parallel>], iteration_bounds = array<i64: 2, 1>, scalar_prefetch = 0 : i64, scratch_operands = 0 : i64, tpu.core_type = #tpu.core_type<tc>, window_params = [{transform_indices = @transform_0, window_bounds = array<i64: 1, 16, 1024>}, {transform_indices = @transform_1, window_bounds = array<i64: 1, 16, 1>}, {transform_indices = @transform_2, window_bounds = array<i64: 1, 16, 1024>}]} {
    %c0 = arith.constant 0 : index
    %c0_0 = arith.constant 0 : index
    %c0_1 = arith.constant 0 : index
    %0 = vector.load %arg2[%c0, %c0_0, %c0_1] : memref<1x16x1024xf32, #tpu.memory_space<vmem>>, vector<1x16x1024xf32>
    %1 = vector.shape_cast %0 : vector<1x16x1024xf32> to vector<16x1024xf32>
    %c0_2 = arith.constant 0 : index
    %c0_3 = arith.constant 0 : index
    %c0_4 = arith.constant 0 : index
    %2 = vector.load %arg3[%c0_2, %c0_3, %c0_4] : memref<1x16x1xf32, #tpu.memory_space<vmem>>, vector<1x16x1xf32>
    %3 = vector.shape_cast %2 : vector<1x16x1xf32> to vector<16x1xf32>
    %4 = vector.broadcast %3 : vector<16x1xf32> to vector<16x1024xf32>
    %5 = arith.mulf %1, %4 : vector<16x1024xf32>
    %c0_5 = arith.constant 0 : index
    %c0_6 = arith.constant 0 : index
    %c0_7 = arith.constant 0 : index
    %6 = vector.load %arg4[%c0_5, %c0_6, %c0_7] : memref<1x16x1024xf32, #tpu.memory_space<vmem>>, vector<1x16x1024xf32>
    %7 = vector.shape_cast %6 : vector<1x16x1024xf32> to vector<16x1024xf32>
    %8 = vector.shape_cast %5 : vector<16x1024xf32> to vector<1x16x1024xf32>
    tpu.vector_store %arg4[%c0_5, %c0_6, %c0_7], %8 {strides = array<i32>} : memref<1x16x1024xf32, #tpu.memory_space<vmem>>, vector<1x16x1024xf32>,
    return
  }
  func.func @transform_0(%arg0: i32, %arg1: i32) -> (i32, i32, i32) {
    %c0_i32 = arith.constant 0 : i32
    %c0_i32_0 = arith.constant 0 : i32
    return %arg0, %c0_i32, %arg1 : i32, i32, i32
  }
  func.func @transform_1(%arg0: i32, %arg1: i32) -> (i32, i32, i32) {
    %c0_i32 = arith.constant 0 : i32
    %c0_i32_0 = arith.constant 0 : i32
    %c0_i32_1 = arith.constant 0 : i32
    return %arg0, %c0_i32, %c0_i32_0 : i32, i32, i32
  }
  func.func @transform_2(%arg0: i32, %arg1: i32) -> (i32, i32, i32) {
    %c0_i32 = arith.constant 0 : i32
    %c0_i32_0 = arith.constant 0 : i32
    return %arg0, %c0_i32, %arg1 : i32, i32, i32
  }
}

</mosaic_0001>

<bundles_post_ra>
// kernel: se_block_forward.3
= control target key start
LH: loop header
LB: loop body
LE: loop exit
PB: predicated region body
PF: predicated region fallthrough
CT: control target
= control target key end

     0   :  { %s444_s9 = smov 0   ;;  %s446_s10 = smov 0   ;;  %s498_s0 = inlined_call_operand.vmem [shape: f32[2,16,1024], index: 0, kind: input, shape index: {}]   ;;  %s499_s1 = inlined_call_operand.vmem [shape: f32[2,16,1], index: 1, kind: input, shape index: {}]   ;;  %s500_s2 = inlined_call_operand.vmem [shape: f32[2,16,1024], index: 2, kind: output, shape index: {}]  }
   0x1   :  { %s448_s11 = smov 0  }
   0x2 LB: > { %s24_s12 = sadd.s32 1, %s422_s10  ;;  %p366_p0 = scmp.ge.s32.totalorder %s426_s11, 1  ;;  %s426_s11 = sphi %s448_s11, %s12_s11   ;;  %s422_s10 = sphi %s446_s10, %s502_s10   ;;  %s418_s9 = sphi %s444_s9, %s501_s9  }
   0x3   : > { %p26_p1 = scmp.ge.s32.totalorder %s24_s12, 2  ;;  %p143_p2 = scmp.lt.s32.totalorder %s426_s11, 3 }
   0x5   : > { %s504_s12 = smov (%p26_p1, %s24_s12), 0  ;;  %p144_p3 = pnand %p366_p0, %p143_p2 }
   0x6   : > { %p179_p4 = scmp.lt.s32.totalorder (!%p144_p3), %s418_s9, 1  ;;  %v428_v0 = vmov (!%p144_p3), 0  }
   0x7   : > { %147 = sbr.rel (%p144_p3) target bundleno = 156 (0x9c), region = 28  ;;  %403 = vset.pattern.permute.xlu0 (!%p144_p3), %v428_v0 }
   0xe   : > { %s506_s9 = smov (!%p179_p4, %s418_s9), 1 }
   0xf   : > { %s376_s13 = sshll.u32 %s506_s9, 4  ;;  %s375_s17 = sshll.u32 %s506_s9, 7 }
  0x10   : > { %s192_s16 = scalar_lea.vmem %s499_s1, %s376_s13  ;;  %s186_s20 = scalar_lea.vmem %s498_s0, %s375_s17 }
  0x11   : > { %v219_v1 = vld [vmem:[%s192_s16] sm:$0xff]  ;;  %v220_v2 = vld [vmem:[%s192_s16 + $0x8] sm:$0xff]  ;;  %v205_v5 = vld [vmem:[%s186_s20 + $0x10] sm:$0xff]  ;;  %s471_s23 = scalar_lea.vmem %s500_s2, %s375_s17 }
  0x12   : > { %223 = vperm.xlu0 %403, %v219_v1   ;;  %v203_v3 = vld [vmem:[%s186_s20] sm:$0xff]  ;;  %v204_v4 = vld [vmem:[%s186_s20 + $0x8] sm:$0xff]  ;;  %v206_v6 = vld [vmem:[%s186_s20 + $0x18] sm:$0xff] }
  0x13   : > { %v207_v7 = vld [vmem:[%s186_s20 + $0x20] sm:$0xff]  ;;  %v208_v8 = vld [vmem:[%s186_s20 + $0x28] sm:$0xff]  ;;  %v209_v9 = vld [vmem:[%s186_s20 + $0x30] sm:$0xff] }
  0x14   : > { %v210_v10 = vld [vmem:[%s186_s20 + $0x38] sm:$0xff]  ;;  %v211_v16 = vld [vmem:[%s186_s20 + $0x40] sm:$0xff]  ;;  %v212_v17 = vld [vmem:[%s186_s20 + $0x48] sm:$0xff] }
  0x15   : > { %v213_v22 = vld [vmem:[%s186_s20 + $0x50] sm:$0xff]  ;;  %v214_v23 = vld [vmem:[%s186_s20 + $0x58] sm:$0xff]  ;;  %v215_v24 = vld [vmem:[%s186_s20 + $0x60] sm:$0xff] }
  0x16   : > { %228 = vperm.xlu0 %403, %v220_v2   ;;  %v216_v25 = vld [vmem:[%s186_s20 + $0x68] sm:$0xff]  ;;  %v217_v26 = vld [vmem:[%s186_s20 + $0x70] sm:$0xff]  ;;  %v218_v27 = vld [vmem:[%s186_s20 + $0x78] sm:$0xff] }
  0x91   : > { %v224_v11 = vpop.permute.xlu0 %223 }
  0x92   : > { %v231_v12 = vmul.f32 %v224_v11, %v203_v3  ;;  %v232_v13 = vmul.f32 %v224_v11, %v204_v4  ;;  %v233_v14 = vmul.f32 %v224_v11, %v205_v5  ;;  %v234_v15 = vmul.f32 %v224_v11, %v206_v6 }
  0x93   : > { %v235_v18 = vmul.f32 %v224_v11, %v207_v7  ;;  %v236_v19 = vmul.f32 %v224_v11, %v208_v8  ;;  %v237_v20 = vmul.f32 %v224_v11, %v209_v9  ;;  %v238_v21 = vmul.f32 %v224_v11, %v210_v10 }
  0x94   : > { %247 = vst [vmem:[%s471_s23] sm:$0xff] %v231_v12  ;;  %248 = vst [vmem:[%s471_s23 + $0x8] sm:$0xff] %v232_v13 }
  0x95   : > { %249 = vst [vmem:[%s471_s23 + $0x10] sm:$0xff] %v233_v14  ;;  %250 = vst [vmem:[%s471_s23 + $0x18] sm:$0xff] %v234_v15  ;;  %v229_v28 = vpop.permute.xlu0 %228 }
  0x96   : > { %251 = vst [vmem:[%s471_s23 + $0x20] sm:$0xff] %v235_v18  ;;  %252 = vst [vmem:[%s471_s23 + $0x28] sm:$0xff] %v236_v19  ;;  %v239_v29 = vmul.f32 %v229_v28, %v211_v16  ;;  %v240_v30 = vmul.f32 %v229_v28, %v212_v17  ;;  %v241_v31 = vmul.f32 %v229_v28, %v213_v22 }
  0x97   : > { %253 = vst [vmem:[%s471_s23 + $0x30] sm:$0xff] %v237_v20  ;;  %254 = vst [vmem:[%s471_s23 + $0x38] sm:$0xff] %v238_v21  ;;  %v242_v32 = vmul.f32 %v229_v28, %v214_v23  ;;  %v243_v33 = vmul.f32 %v229_v28, %v215_v24  ;;  %v244_v34 = vmul.f32 %v229_v28, %v216_v25 }
  0x98   : > { %v245_v35 = vmul.f32 %v229_v28, %v217_v26  ;;  %v246_v36 = vmul.f32 %v229_v28, %v218_v27  ;;  %255 = vst [vmem:[%s471_s23 + $0x40] sm:$0xff] %v239_v29  ;;  %256 = vst [vmem:[%s471_s23 + $0x48] sm:$0xff] %v240_v30 }
  0x99   : > { %257 = vst [vmem:[%s471_s23 + $0x50] sm:$0xff] %v241_v31  ;;  %258 = vst [vmem:[%s471_s23 + $0x58] sm:$0xff] %v242_v32 }
  0x9a   : > { %259 = vst [vmem:[%s471_s23 + $0x60] sm:$0xff] %v243_v33  ;;  %260 = vst [vmem:[%s471_s23 + $0x68] sm:$0xff] %v244_v34 }
  0x9b   : > { %261 = vst [vmem:[%s471_s23 + $0x70] sm:$0xff] %v245_v35  ;;  %262 = vst [vmem:[%s471_s23 + $0x78] sm:$0xff] %v246_v36 }
  0x9c PF: > { %s12_s11 = sadd.s32 1, %s426_s11   ;;  %s501_s9 = smov %s422_s10 }
  0x9d   : > { %p9_p5 = scmp.ge.s32.totalorder %s12_s11, 4   ;;  %s502_s10 = smov %s504_s12 }
  0x9f   :  { %11 = sbr.rel (!%p9_p5) target bundleno = 2 (0x2), region = 61 }

// kernel: se_block_forward.2
= control target key start
LH: loop header
LB: loop body
LE: loop exit
PB: predicated region body
PF: predicated region fallthrough
CT: control target
= control target key end

     0   :  { %vm1494_vm0 = vmmov 0   ;;  %vm853_vm1 = vcmask 130048   ;;  %s2341_s1 = inlined_call_operand.vmem [shape: f32[2048,16], index: 1, kind: input, shape index: {}]   ;;  %s2342_s0 = inlined_call_operand.vmem [shape: f32[8,2048], index: 0, kind: input, shape index: {}]   ;;  %s2343_s2 = inlined_call_operand.vmem [shape: f32[16,16], index: 2, kind: input, shape index: {}]   ;;  %s2344_s3 = inlined_call_operand.vmem [shape: f32[8,16], index: 3, kind: output, shape index: {}]  }
   0x1   :  { %v46_v0 = vld [vmem:[%s2341_s1 + $0x80] sm:$0xff]  ;;  %v47_v1 = vld [vmem:[%s2341_s1 + $0x88] sm:$0xff]  ;;  %v48_v11 = vld [vmem:[%s2341_s1 + $0x90] sm:$0xff] }
   0x2   :  { %v78_v2 = vld [vmem:[%s2341_s1 + $0x180] sm:$0xff]  ;;  %v1227_v3 = vpack.c.bf16 %v47_v1, %v46_v0  ;;  %v79_v4 = vld [vmem:[%s2341_s1 + $0x188] sm:$0xff]  ;;  %v49_v13 = vld [vmem:[%s2341_s1 + $0x98] sm:$0xff] }
   0x3   :  { %v30_v5 = vld [vmem:[%s2341_s1] sm:$0xff]  ;;  %v31_v6 = vld [vmem:[%s2341_s1 + $0x8] sm:$0xff]  ;;  %v1259_v7 = vpack.c.bf16 %v79_v4, %v78_v2  ;;  %v80_v14 = vld [vmem:[%s2341_s1 + $0x190] sm:$0xff]  ;;  %v1231_v16 = vpack.c.bf16 %v49_v13, %v48_v11 }
   0x4   :  { %v1229_v8 = vpack.c.bf16 %v31_v6, %v30_v5  ;;  %v62_v9 = vld [vmem:[%s2341_s1 + $0x100] sm:$0xff]  ;;  %v63_v10 = vld [vmem:[%s2341_s1 + $0x108] sm:$0xff]  ;;  %1228 = vmatprep.subr.bf16.mxu0 %v1227_v3  ;;  %v81_v15 = vld [vmem:[%s2341_s1 + $0x198] sm:$0xff] }
   0x5   :  { %v1261_v12 = vpack.c.bf16 %v63_v10, %v62_v9  ;;  %1260 = vmatprep.subr.bf16.mxu1 %v1259_v7  ;;  %v1263_v17 = vpack.c.bf16 %v81_v15, %v80_v14  ;;  %v32_v18 = vld [vmem:[%s2341_s1 + $0x10] sm:$0xff]  ;;  %v33_v19 = vld [vmem:[%s2341_s1 + $0x18] sm:$0xff]  ;;  %v50_v23 = vld [vmem:[%s2341_s1 + $0xa0] sm:$0xff] }
   0x6   :  { %1230 = vmatpush3.bf16.msra.mxu0 %v1229_v8  ;;  %v64_v20 = vld [vmem:[%s2341_s1 + $0x110] sm:$0xff]  ;;  %v1233_v21 = vpack.c.bf16 %v33_v19, %v32_v18  ;;  %v65_v22 = vld [vmem:[%s2341_s1 + $0x118] sm:$0xff]  ;;  %v51_v24 = vld [vmem:[%s2341_s1 + $0xa8] sm:$0xff] }
   0x7   :  { %1262 = vmatpush3.bf16.msra.mxu1 %v1261_v12  ;;  %1232 = vmatprep.subr.bf16.mxu0 %v1231_v16  ;;  %v1265_v25 = vpack.c.bf16 %v65_v22, %v64_v20  ;;  %v1235_v26 = vpack.c.bf16 %v51_v24, %v50_v23  ;;  %v82_v27 = vld [vmem:[%s2341_s1 + $0x1a0] sm:$0xff]  ;;  %v83_v28 = vld [vmem:[%s2341_s1 + $0x1a8] sm:$0xff]  ;;  %v52_v35 = vld [vmem:[%s2341_s1 + $0xb0] sm:$0xff] }
   0x8   :  { %1264 = vmatprep.subr.bf16.mxu1 %v1263_v17  ;;  %v34_v29 = vld [vmem:[%s2341_s1 + $0x20] sm:$0xff]  ;;  %v1267_v30 = vpack.c.bf16 %v83_v28, %v82_v27  ;;  %v35_v31 = vld [vmem:[%s2341_s1 + $0x28] sm:$0xff]  ;;  %v53_v36 = vld [vmem:[%s2341_s1 + $0xb8] sm:$0xff] }
   0x9   :  { %v66_v32 = vld [vmem:[%s2341_s1 + $0x120] sm:$0xff]  ;;  %v67_v33 = vld [vmem:[%s2341_s1 + $0x128] sm:$0xff]  ;;  %v1237_v34 = vpack.c.bf16 %v35_v31, %v34_v29  ;;  %v84_v37 = vld [vmem:[%s2341_s1 + $0x1b0] sm:$0xff]  ;;  %v1239_v39 = vpack.c.bf16 %v53_v36, %v52_v35 }
   0xa   :  { %1234 = vmatpush3.bf16.msra.mxu0 %v1233_v21  ;;  %v1269_v38 = vpack.c.bf16 %v67_v33, %v66_v32  ;;  %v85_v40 = vld [vmem:[%s2341_s1 + $0x1b8] sm:$0xff]  ;;  %v36_v41 = vld [vmem:[%s2341_s1 + $0x30] sm:$0xff]  ;;  %v54_v46 = vld [vmem:[%s2341_s1 + $0xc0] sm:$0xff] }
   0xb   :  { %1266 = vmatpush3.bf16.msra.mxu1 %v1265_v25  ;;  %1236 = vmatprep.subr.bf16.mxu0 %v1235_v26  ;;  %v37_v42 = vld [vmem:[%s2341_s1 + $0x38] sm:$0xff]  ;;  %v1271_v43 = vpack.c.bf16 %v85_v40, %v84_v37  ;;  %v68_v44 = vld [vmem:[%s2341_s1 + $0x130] sm:$0xff]  ;;  %v55_v47 = vld [vmem:[%s2341_s1 + $0xc8] sm:$0xff] }
   0xc   :  { %1268 = vmatprep.subr.bf16.mxu1 %v1267_v30  ;;  %v69_v45 = vld [vmem:[%s2341_s1 + $0x138] sm:$0xff]  ;;  %v86_v48 = vld [vmem:[%s2341_s1 + $0x1c0] sm:$0xff]  ;;  %v87_v49 = vld [vmem:[%s2341_s1 + $0x1c8] sm:$0xff]  ;;  %v1241_v50 = vpack.c.bf16 %v37_v42, %v36_v41  ;;  %v1243_v52 = vpack.c.bf16 %v55_v47, %v54_v46 }
   0xd   :  { %v1273_v51 = vpack.c.bf16 %v69_v45, %v68_v44  ;;  %v38_v53 = vld [vmem:[%s2341_s1 + $0x40] sm:$0xff]  ;;  %v39_v54 = vld [vmem:[%s2341_s1 + $0x48] sm:$0xff]  ;;  %v1275_v56 = vpack.c.bf16 %v87_v49, %v86_v48  ;;  %v56_v58 = vld [vmem:[%s2341_s1 + $0xd0] sm:$0xff] }
   0xe   :  { %1238 = vmatpush3.bf16.msra.mxu0 %v1237_v34  ;;  %v70_v55 = vld [vmem:[%s2341_s1 + $0x140] sm:$0xff]  ;;  %v71_v57 = vld [vmem:[%s2341_s1 + $0x148] sm:$0xff]  ;;  %v57_v59 = vld [vmem:[%s2341_s1 + $0xd8] sm:$0xff]  ;;  %v1245_v62 = vpack.c.bf16 %v39_v54, %v38_v53 }
   0xf   :  { %1270 = vmatpush3.bf16.msra.mxu1 %v1269_v38  ;;  %1240 = vmatprep.subr.bf16.mxu0 %v1239_v39  ;;  %v88_v60 = vld [vmem:[%s2341_s1 + $0x1d0] sm:$0xff]  ;;  %v89_v61 = vld [vmem:[%s2341_s1 + $0x1d8] sm:$0xff]  ;;  %v1277_v63 = vpack.c.bf16 %v71_v57, %v70_v55  ;;  %v1247_v0 = vpack.c.bf16 %v57_v59, %v56_v58  ;;  %v58_v6 = vld [vmem:[%s2341_s1 + $0xe0] sm:$0xff] }
  0x10   :  { %1272 = vmatprep.subr.bf16.mxu1 %v1271_v43  ;;  %v40_v1 = vld [vmem:[%s2341_s1 + $0x50] sm:$0xff]  ;;  %v41_v2 = vld [vmem:[%s2341_s1 + $0x58] sm:$0xff]  ;;  %v1279_v4 = vpack.c.bf16 %v89_v61, %v88_v60  ;;  %v59_v7 = vld [vmem:[%s2341_s1 + $0xe8] sm:$0xff] }
  0x11   :  { %v72_v3 = vld [vmem:[%s2341_s1 + $0x150] sm:$0xff]  ;;  %v73_v5 = vld [vmem:[%s2341_s1 + $0x158] sm:$0xff]  ;;  %v90_v8 = vld [vmem:[%s2341_s1 + $0x1e0] sm:$0xff]  ;;  %v1249_v10 = vpack.c.bf16 %v41_v2, %v40_v1  ;;  %v1251_v14 = vpack.c.bf16 %v59_v7, %v58_v6 }
  0x12   :  { %1242 = vmatpush3.bf16.msra.mxu0 %v1241_v50  ;;  %v91_v9 = vld [vmem:[%s2341_s1 + $0x1e8] sm:$0xff]  ;;  %v42_v11 = vld [vmem:[%s2341_s1 + $0x60] sm:$0xff]  ;;  %v1281_v13 = vpack.c.bf16 %v73_v5, %v72_v3  ;;  %v17_v17 = vld [vmem:[%s2342_s0 + $0x18] sm:$0xff] }
  0x13   :  { %1274 = vmatpush3.bf16.msra.mxu1 %v1273_v51  ;;  %1244 = vmatprep.subr.bf16.mxu0 %v1243_v52  ;;  %v43_v12 = vld [vmem:[%s2341_s1 + $0x68] sm:$0xff]  ;;  %v74_v15 = vld [vmem:[%s2341_s1 + $0x160] sm:$0xff]  ;;  %v1283_v18 = vpack.c.bf16 %v91_v9, %v90_v8  ;;  %v60_v20 = vld [vmem:[%s2341_s1 + $0xf0] sm:$0xff] }
  0x14   :  { %1276 = vmatprep.subr.bf16.mxu1 %v1275_v56  ;;  %v15_v16 = vld [vmem:[%s2342_s0 + $0x8] sm:$0xff]  ;;  %v61_v21 = vld [vmem:[%s2341_s1 + $0xf8] sm:$0xff]  ;;  %v92_v22 = vld [vmem:[%s2341_s1 + $0x1f0] sm:$0xff]  ;;  %420 = vmatprep.mubr.f32.mxu1 %v17_v17  ;;  %v1253_v24 = vpack.c.bf16 %v43_v12, %v42_v11 }
  0x15   :  { %v75_v19 = vld [vmem:[%s2341_s1 + $0x168] sm:$0xff]  ;;  %350 = vmatprep.mubr.f32.mxu0 %v15_v16  ;;  %v93_v23 = vld [vmem:[%s2341_s1 + $0x1f8] sm:$0xff]  ;;  %v1255_v26 = vpack.c.bf16 %v61_v21, %v60_v20  ;;  %v44_v27 = vld [vmem:[%s2341_s1 + $0x70] sm:$0xff] }
  0x16   :  { %1246 = vmatpush3.bf16.msra.mxu0 %v1245_v62  ;;  %v1285_v25 = vpack.c.bf16 %v75_v19, %v74_v15  ;;  %v45_v28 = vld [vmem:[%s2341_s1 + $0x78] sm:$0xff]  ;;  %v76_v29 = vld [vmem:[%s2341_s1 + $0x170] sm:$0xff]  ;;  %v1287_v30 = vpack.c.bf16 %v93_v23, %v92_v22  ;;  %v110_v32 = vld [vmem:[%s2341_s1 + $0x280] sm:$0xff] }
  0x17   :  { %1278 = vmatpush3.bf16.msra.mxu1 %v1277_v63  ;;  %1248 = vmatprep.subr.bf16.mxu0 %v1247_v0  ;;  %v77_v31 = vld [vmem:[%s2341_s1 + $0x178] sm:$0xff]  ;;  %v111_v33 = vld [vmem:[%s2341_s1 + $0x288] sm:$0xff]  ;;  %v142_v34 = vld [vmem:[%s2341_s1 + $0x380] sm:$0xff]  ;;  %v1257_v36 = vpack.c.bf16 %v45_v28, %v44_v27 }
  0x18   :  { %1280 = vmatprep.subr.bf16.mxu1 %v1279_v4  ;;  %v143_v35 = vld [vmem:[%s2341_s1 + $0x388] sm:$0xff]  ;;  %v1289_v37 = vpack.c.bf16 %v77_v31, %v76_v29  ;;  %v1291_v38 = vpack.c.bf16 %v111_v33, %v110_v32  ;;  %v94_v39 = vld [vmem:[%s2341_s1 + $0x200] sm:$0xff]  ;;  %v112_v44 = vld [vmem:[%s2341_s1 + $0x290] sm:$0xff] }
  0x19   :  { %v95_v40 = vld [vmem:[%s2341_s1 + $0x208] sm:$0xff]  ;;  %v126_v41 = vld [vmem:[%s2341_s1 + $0x300] sm:$0xff]  ;;  %v1323_v42 = vpack.c.bf16 %v143_v35, %v142_v34  ;;  %v113_v45 = vld [vmem:[%s2341_s1 + $0x298] sm:$0xff] }
  0x1a   :  { %1250 = vmatpush3.bf16.msra.mxu0 %v1249_v10  ;;  %v127_v43 = vld [vmem:[%s2341_s1 + $0x308] sm:$0xff]  ;;  %v144_v46 = vld [vmem:[%s2341_s1 + $0x390] sm:$0xff]  ;;  %v145_v47 = vld [vmem:[%s2341_s1 + $0x398] sm:$0xff]  ;;  %v1293_v50 = vpack.c.bf16 %v95_v40, %v94_v39  ;;  %v1295_v52 = vpack.c.bf16 %v113_v45, %v112_v44 }
  0x1b   :  { %1282 = vmatpush3.bf16.msra.mxu1 %v1281_v13  ;;  %1252 = vmatprep.subr.bf16.mxu0 %v1251_v14  ;;  %v14_v48 = vld [vmem:[%s2342_s0] sm:$0xff]  ;;  %v16_v49 = vld [vmem:[%s2342_s0 + $0x10] sm:$0xff]  ;;  %v1325_v51 = vpack.c.bf16 %v127_v43, %v126_v41  ;;  %v97_v54 = vld [vmem:[%s2341_s1 + $0x218] sm:$0xff]  ;;  %v1327_v56 = vpack.c.bf16 %v145_v47, %v144_v46 }
  0x1c   :  { %1284 = vmatprep.subr.bf16.mxu1 %v1283_v18  ;;  %v96_v53 = vld [vmem:[%s2341_s1 + $0x210] sm:$0xff]  ;;  %v129_v57 = vld [vmem:[%s2341_s1 + $0x318] sm:$0xff]  ;;  %v114_v58 = vld [vmem:[%s2341_s1 + $0x2a0] sm:$0xff] }
  0x1d   :  { %v128_v55 = vld [vmem:[%s2341_s1 + $0x310] sm:$0xff]  ;;  %v115_v59 = vld [vmem:[%s2341_s1 + $0x2a8] sm:$0xff]  ;;  %v146_v60 = vld [vmem:[%s2341_s1 + $0x3a0] sm:$0xff]  ;;  %v1297_v62 = vpack.c.bf16 %v97_v54, %v96_v53 }
  0x1e   :  { %1254 = vmatpush3.bf16.msra.mxu0 %v1253_v24  ;;  %v147_v61 = vld [vmem:[%s2341_s1 + $0x3a8] sm:$0xff]  ;;  %v1329_v63 = vpack.c.bf16 %v129_v57, %v128_v55  ;;  %v1299_v0 = vpack.c.bf16 %v115_v59, %v114_v58  ;;  %v98_v1 = vld [vmem:[%s2341_s1 + $0x220] sm:$0xff]  ;;  %v116_v6 = vld [vmem:[%s2341_s1 + $0x2b0] sm:$0xff] }
  0x1f   :  { %1286 = vmatpush3.bf16.msra.mxu1 %v1285_v25  ;;  %1256 = vmatprep.subr.bf16.mxu0 %v1255_v26  ;;  %v99_v2 = vld [vmem:[%s2341_s1 + $0x228] sm:$0xff]  ;;  %v130_v3 = vld [vmem:[%s2341_s1 + $0x320] sm:$0xff]  ;;  %v1331_v4 = vpack.c.bf16 %v147_v61, %v146_v60  ;;  %v117_v7 = vld [vmem:[%s2341_s1 + $0x2b8] sm:$0xff] }
  0x20   :  { %1288 = vmatprep.subr.bf16.mxu1 %v1287_v30  ;;  %v131_v5 = vld [vmem:[%s2341_s1 + $0x328] sm:$0xff]  ;;  %v148_v8 = vld [vmem:[%s2341_s1 + $0x3b0] sm:$0xff]  ;;  %v149_v9 = vld [vmem:[%s2341_s1 + $0x3b8] sm:$0xff]  ;;  %v1301_v10 = vpack.c.bf16 %v99_v2, %v98_v1  ;;  %v1303_v12 = vpack.c.bf16 %v117_v7, %v116_v6 }
  0x21   :  { %v1333_v11 = vpack.c.bf16 %v131_v5, %v130_v3  ;;  %v100_v13 = vld [vmem:[%s2341_s1 + $0x230] sm:$0xff]  ;;  %v101_v14 = vld [vmem:[%s2341_s1 + $0x238] sm:$0xff]  ;;  %v1335_v16 = vpack.c.bf16 %v149_v9, %v148_v8  ;;  %v118_v18 = vld [vmem:[%s2341_s1 + $0x2c0] sm:$0xff] }
  0x22   :  { %1258 = vmatpush3.bf16.msra.mxu0 %v1257_v36  ;;  %v132_v15 = vld [vmem:[%s2341_s1 + $0x330] sm:$0xff]  ;;  %v133_v17 = vld [vmem:[%s2341_s1 + $0x338] sm:$0xff]  ;;  %v119_v19 = vld [vmem:[%s2341_s1 + $0x2c8] sm:$0xff]  ;;  %v1305_v22 = vpack.c.bf16 %v101_v14, %v100_v13 }
  0x23   :  { %1290 = vmatpush3.bf16.msra.mxu1 %v1289_v37  ;;  %1292 = vmatprep.subr.bf16.mxu0 %v1291_v38  ;;  %v150_v20 = vld [vmem:[%s2341_s1 + $0x3c0] sm:$0xff]  ;;  %v151_v21 = vld [vmem:[%s2341_s1 + $0x3c8] sm:$0xff]  ;;  %v1337_v25 = vpack.c.bf16 %v133_v17, %v132_v15  ;;  %v1307_v26 = vpack.c.bf16 %v119_v19, %v118_v18  ;;  %v21_v29 = vld [vmem:[%s2342_s0 + $0x38] sm:$0xff] }
  0x24   :  { %1324 = vmatprep.subr.bf16.mxu1 %v1323_v42  ;;  %v102_v23 = vld [vmem:[%s2341_s1 + $0x240] sm:$0xff]  ;;  %v19_v24 = vld [vmem:[%s2342_s0 + $0x28] sm:$0xff]  ;;  %v1339_v30 = vpack.c.bf16 %v151_v21, %v150_v20  ;;  %v120_v32 = vld [vmem:[%s2341_s1 + $0x2d0] sm:$0xff] }
  0x25   :  { %351 = vmatmul.mubr.f32.vlgmr.msra.gmra.mrb[0].mxu0 %v14_v48  ;;  %v103_v27 = vld [vmem:[%s2341_s1 + $0x248] sm:$0xff]  ;;  %v134_v28 = vld [vmem:[%s2341_s1 + $0x340] sm:$0xff]  ;;  %v121_v33 = vld [vmem:[%s2341_s1 + $0x2d8] sm:$0xff] }
  0x26   :  { %421 = vmatmul.mubr.f32.vlgmr.msra.gmra.mrb[0].mxu1 %v16_v49  ;;  %1294 = vmatpush3.bf16.msra.mxu0 %v1293_v50  ;;  %v135_v31 = vld [vmem:[%s2341_s1 + $0x348] sm:$0xff]  ;;  %v152_v34 = vld [vmem:[%s2341_s1 + $0x3d0] sm:$0xff]  ;;  %v153_v35 = vld [vmem:[%s2341_s1 + $0x3d8] sm:$0xff]  ;;  %v1309_v36 = vpack.c.bf16 %v103_v27, %v102_v23  ;;  %v1311_v38 = vpack.c.bf16 %v121_v33, %v120_v32 }
  0x27   :  { %1326 = vmatpush3.bf16.msra.mxu1 %v1325_v51  ;;  %1296 = vmatprep.subr.bf16.mxu0 %v1295_v52  ;;  %v1341_v37 = vpack.c.bf16 %v135_v31, %v134_v28  ;;  %v104_v39 = vld [vmem:[%s2341_s1 + $0x250] sm:$0xff]  ;;  %v105_v40 = vld [vmem:[%s2341_s1 + $0x258] sm:$0xff]  ;;  %v1343_v42 = vpack.c.bf16 %v153_v35, %v152_v34  ;;  %v122_v44 = vld [vmem:[%s2341_s1 + $0x2e0] sm:$0xff] }
  0x28   :  { %1328 = vmatprep.subr.bf16.mxu1 %v1327_v56  ;;  %490 = vmatprep.mubr.f32.mxu0 %v19_v24  ;;  %v136_v41 = vld [vmem:[%s2341_s1 + $0x350] sm:$0xff]  ;;  %v137_v43 = vld [vmem:[%s2341_s1 + $0x358] sm:$0xff]  ;;  %v123_v45 = vld [vmem:[%s2341_s1 + $0x2e8] sm:$0xff]  ;;  %v1313_v48 = vpack.c.bf16 %v105_v40, %v104_v39 }
  0x29   :  { %560 = vmatprep.mubr.f32.mxu1 %v21_v29  ;;  %v154_v46 = vld [vmem:[%s2341_s1 + $0x3e0] sm:$0xff]  ;;  %v155_v47 = vld [vmem:[%s2341_s1 + $0x3e8] sm:$0xff]  ;;  %v1345_v49 = vpack.c.bf16 %v137_v43, %v136_v41  ;;  %v1315_v50 = vpack.c.bf16 %v123_v45, %v122_v44  ;;  %v124_v56 = vld [vmem:[%s2341_s1 + $0x2f0] sm:$0xff] }
  0x2a   :  { %1298 = vmatpush3.bf16.msra.mxu0 %v1297_v62  ;;  %v106_v51 = vld [vmem:[%s2341_s1 + $0x260] sm:$0xff]  ;;  %v107_v52 = vld [vmem:[%s2341_s1 + $0x268] sm:$0xff]  ;;  %v1347_v54 = vpack.c.bf16 %v155_v47, %v154_v46  ;;  %v125_v57 = vld [vmem:[%s2341_s1 + $0x2f8] sm:$0xff] }
  0x2b   :  { %1330 = vmatpush3.bf16.msra.mxu1 %v1329_v63  ;;  %1300 = vmatprep.subr.bf16.mxu0 %v1299_v0  ;;  %v138_v53 = vld [vmem:[%s2341_s1 + $0x360] sm:$0xff]  ;;  %v139_v55 = vld [vmem:[%s2341_s1 + $0x368] sm:$0xff]  ;;  %v156_v58 = vld [vmem:[%s2341_s1 + $0x3f0] sm:$0xff]  ;;  %v1317_v60 = vpack.c.bf16 %v107_v52, %v106_v51  ;;  %v1319_v62 = vpack.c.bf16 %v125_v57, %v124_v56 }
  0x2c   :  { %1332 = vmatprep.subr.bf16.mxu1 %v1331_v4  ;;  %v157_v59 = vld [vmem:[%s2341_s1 + $0x3f8] sm:$0xff]  ;;  %v1349_v61 = vpack.c.bf16 %v139_v55, %v138_v53  ;;  %v108_v63 = vld [vmem:[%s2341_s1 + $0x270] sm:$0xff]  ;;  %v174_v4 = vld [vmem:[%s2341_s1 + $0x480] sm:$0xff] }
  0x2d   :  { %v109_v0 = vld [vmem:[%s2341_s1 + $0x278] sm:$0xff]  ;;  %v140_v1 = vld [vmem:[%s2341_s1 + $0x370] sm:$0xff]  ;;  %v1351_v2 = vpack.c.bf16 %v157_v59, %v156_v58  ;;  %v175_v5 = vld [vmem:[%s2341_s1 + $0x488] sm:$0xff] }
  0x2e   :  { %1302 = vmatpush3.bf16.msra.mxu0 %v1301_v10  ;;  %v141_v3 = vld [vmem:[%s2341_s1 + $0x378] sm:$0xff]  ;;  %v206_v6 = vld [vmem:[%s2341_s1 + $0x580] sm:$0xff]  ;;  %v207_v7 = vld [vmem:[%s2341_s1 + $0x588] sm:$0xff]  ;;  %v1321_v8 = vpack.c.bf16 %v109_v0, %v108_v63  ;;  %v1355_v10 = vpack.c.bf16 %v175_v5, %v174_v4 }
  0x2f   :  { %1334 = vmatpush3.bf16.msra.mxu1 %v1333_v11  ;;  %1304 = vmatprep.subr.bf16.mxu0 %v1303_v12  ;;  %v1353_v9 = vpack.c.bf16 %v141_v3, %v140_v1  ;;  %v158_v11 = vld [vmem:[%s2341_s1 + $0x400] sm:$0xff]  ;;  %v159_v12 = vld [vmem:[%s2341_s1 + $0x408] sm:$0xff]  ;;  %v1387_v14 = vpack.c.bf16 %v207_v7, %v206_v6  ;;  %v177_v17 = vld [vmem:[%s2341_s1 + $0x498] sm:$0xff] }
  0x30   :  { %1336 = vmatprep.subr.bf16.mxu1 %v1335_v16  ;;  %v190_v13 = vld [vmem:[%s2341_s1 + $0x500] sm:$0xff]  ;;  %v191_v15 = vld [vmem:[%s2341_s1 + $0x508] sm:$0xff]  ;;  %v176_v16 = vld [vmem:[%s2341_s1 + $0x490] sm:$0xff]  ;;  %v1357_v21 = vpack.c.bf16 %v159_v12, %v158_v11 }
  0x31   :  { %v208_v18 = vld [vmem:[%s2341_s1 + $0x590] sm:$0xff]  ;;  %v209_v19 = vld [vmem:[%s2341_s1 + $0x598] sm:$0xff]  ;;  %v18_v20 = vld [vmem:[%s2342_s0 + $0x20] sm:$0xff]  ;;  %v1389_v23 = vpack.c.bf16 %v191_v15, %v190_v13  ;;  %v1359_v24 = vpack.c.bf16 %v177_v17, %v176_v16 }
  0x32   :  { %1306 = vmatpush3.bf16.msra.mxu0 %v1305_v22  ;;  %v20_v22 = vld [vmem:[%s2342_s0 + $0x30] sm:$0xff]  ;;  %v1391_v28 = vpack.c.bf16 %v209_v19, %v208_v18  ;;  %v193_v29 = vld [vmem:[%s2341_s1 + $0x518] sm:$0xff]  ;;  %v179_v31 = vld [vmem:[%s2341_s1 + $0x4a8] sm:$0xff] }
  0x33   :  { %1338 = vmatpush3.bf16.msra.mxu1 %v1337_v25  ;;  %1308 = vmatprep.subr.bf16.mxu0 %v1307_v26  ;;  %v160_v25 = vld [vmem:[%s2341_s1 + $0x410] sm:$0xff]  ;;  %v161_v26 = vld [vmem:[%s2341_s1 + $0x418] sm:$0xff]  ;;  %v210_v32 = vld [vmem:[%s2341_s1 + $0x5a0] sm:$0xff] }
  0x34   :  { %1340 = vmatprep.subr.bf16.mxu1 %v1339_v30  ;;  %v192_v27 = vld [vmem:[%s2341_s1 + $0x510] sm:$0xff]  ;;  %v178_v30 = vld [vmem:[%s2341_s1 + $0x4a0] sm:$0xff]  ;;  %v211_v33 = vld [vmem:[%s2341_s1 + $0x5a8] sm:$0xff]  ;;  %v1361_v35 = vpack.c.bf16 %v161_v26, %v160_v25 }
  0x35   :  { %v23_v34 = vld [vmem:[%s2342_s0 + $0x48] sm:$0xff]  ;;  %v162_v39 = vld [vmem:[%s2341_s1 + $0x420] sm:$0xff]  ;;  %v180_v44 = vld [vmem:[%s2341_s1 + $0x4b0] sm:$0xff] }
  0x36   :  { %1310 = vmatpush3.bf16.msra.mxu0 %v1309_v36  ;;  %v25_v36 = vld [vmem:[%s2342_s0 + $0x58] sm:$0xff]  ;;  %v163_v40 = vld [vmem:[%s2341_s1 + $0x428] sm:$0xff]  ;;  %v194_v41 = vld [vmem:[%s2341_s1 + $0x520] sm:$0xff] }
  0x37   :  { %1342 = vmatpush3.bf16.msra.mxu1 %v1341_v37  ;;  %1312 = vmatprep.subr.bf16.mxu0 %v1311_v38  ;;  %v1393_v37 = vpack.c.bf16 %v193_v29, %v192_v27  ;;  %v1363_v38 = vpack.c.bf16 %v179_v31, %v178_v30  ;;  %v195_v43 = vld [vmem:[%s2341_s1 + $0x528] sm:$0xff]  ;;  %v181_v45 = vld [vmem:[%s2341_s1 + $0x4b8] sm:$0xff]  ;;  %v212_v46 = vld [vmem:[%s2341_s1 + $0x5b0] sm:$0xff] }
  0x38   :  { %1344 = vmatprep.subr.bf16.mxu1 %v1343_v42  ;;  %v1395_v42 = vpack.c.bf16 %v211_v33, %v210_v32  ;;  %v213_v47 = vld [vmem:[%s2341_s1 + $0x5b8] sm:$0xff]  ;;  %v164_v51 = vld [vmem:[%s2341_s1 + $0x430] sm:$0xff]  ;;  %v182_v56 = vld [vmem:[%s2341_s1 + $0x4c0] sm:$0xff] }
  0x39   :  { %v165_v52 = vld [vmem:[%s2341_s1 + $0x438] sm:$0xff]  ;;  %v196_v53 = vld [vmem:[%s2341_s1 + $0x530] sm:$0xff]  ;;  %v183_v57 = vld [vmem:[%s2341_s1 + $0x4c8] sm:$0xff] }
  0x3a   :  { %1314 = vmatpush3.bf16.msra.mxu0 %v1313_v48  ;;  %v1365_v48 = vpack.c.bf16 %v163_v40, %v162_v39  ;;  %v197_v55 = vld [vmem:[%s2341_s1 + $0x538] sm:$0xff]  ;;  %v214_v58 = vld [vmem:[%s2341_s1 + $0x5c0] sm:$0xff]  ;;  %v215_v59 = vld [vmem:[%s2341_s1 + $0x5c8] sm:$0xff] }
  0x3b   :  { %1346 = vmatpush3.bf16.msra.mxu1 %v1345_v49  ;;  %1316 = vmatprep.subr.bf16.mxu0 %v1315_v50  ;;  %v1397_v49 = vpack.c.bf16 %v195_v43, %v194_v41  ;;  %v1367_v50 = vpack.c.bf16 %v181_v45, %v180_v44  ;;  %v166_v63 = vld [vmem:[%s2341_s1 + $0x440] sm:$0xff]  ;;  %v167_v0 = vld [vmem:[%s2341_s1 + $0x448] sm:$0xff]  ;;  %v184_v4 = vld [vmem:[%s2341_s1 + $0x4d0] sm:$0xff] }
  0x3c   :  { %1348 = vmatprep.subr.bf16.mxu1 %v1347_v54  ;;  %v1399_v54 = vpack.c.bf16 %v213_v47, %v212_v46  ;;  %v198_v1 = vld [vmem:[%s2341_s1 + $0x540] sm:$0xff]  ;;  %v199_v3 = vld [vmem:[%s2341_s1 + $0x548] sm:$0xff]  ;;  %v185_v5 = vld [vmem:[%s2341_s1 + $0x4d8] sm:$0xff] }
  0x3d   :  { %v216_v6 = vld [vmem:[%s2341_s1 + $0x5d0] sm:$0xff]  ;;  %v217_v7 = vld [vmem:[%s2341_s1 + $0x5d8] sm:$0xff]  ;;  %v186_v16 = vld [vmem:[%s2341_s1 + $0x4e0] sm:$0xff] }
  0x3e   :  { %1318 = vmatpush3.bf16.msra.mxu0 %v1317_v60  ;;  %v1369_v60 = vpack.c.bf16 %v165_v52, %v164_v51  ;;  %v168_v11 = vld [vmem:[%s2341_s1 + $0x450] sm:$0xff]  ;;  %v169_v12 = vld [vmem:[%s2341_s1 + $0x458] sm:$0xff]  ;;  %v187_v17 = vld [vmem:[%s2341_s1 + $0x4e8] sm:$0xff] }
  0x3f   :  { %1350 = vmatpush3.bf16.msra.mxu1 %v1349_v61  ;;  %1320 = vmatprep.subr.bf16.mxu0 %v1319_v62  ;;  %v1401_v61 = vpack.c.bf16 %v197_v55, %v196_v53  ;;  %v1371_v62 = vpack.c.bf16 %v183_v57, %v182_v56  ;;  %v200_v13 = vld [vmem:[%s2341_s1 + $0x550] sm:$0xff]  ;;  %v201_v15 = vld [vmem:[%s2341_s1 + $0x558] sm:$0xff]  ;;  %v218_v18 = vld [vmem:[%s2341_s1 + $0x5e0] sm:$0xff] }
  0x40   :  { %1352 = vmatprep.subr.bf16.mxu1 %v1351_v2  ;;  %v1403_v2 = vpack.c.bf16 %v215_v59, %v214_v58  ;;  %v219_v19 = vld [vmem:[%s2341_s1 + $0x5e8] sm:$0xff]  ;;  %v202_v25 = vld [vmem:[%s2341_s1 + $0x560] sm:$0xff]  ;;  %v189_v29 = vld [vmem:[%s2341_s1 + $0x4f8] sm:$0xff] }
  0x41   :  { %v1411_v26 = vpack.c.bf16 %v219_v19, %v218_v18  ;;  %v203_v27 = vld [vmem:[%s2341_s1 + $0x568] sm:$0xff]  ;;  %v220_v30 = vld [vmem:[%s2341_s1 + $0x5f0] sm:$0xff]  ;;  %v221_v31 = vld [vmem:[%s2341_s1 + $0x5f8] sm:$0xff] }
  0x42   :  { %1322 = vmatpush3.bf16.msra.mxu0 %v1321_v8  ;;  %v1373_v8 = vpack.c.bf16 %v167_v0, %v166_v63  ;;  %v1413_v33 = vpack.c.bf16 %v203_v27, %v202_v25  ;;  %v205_v39 = vld [vmem:[%s2341_s1 + $0x578] sm:$0xff]  ;;  %v238_v40 = vld [vmem:[%s2341_s1 + $0x680] sm:$0xff]  ;;  %v239_v41 = vld [vmem:[%s2341_s1 + $0x688] sm:$0xff] }
  0x43   :  { %1354 = vmatpush3.bf16.msra.mxu1 %v1353_v9  ;;  %1356 = vmatprep.subr.bf16.mxu0 %v1355_v10  ;;  %v1405_v9 = vpack.c.bf16 %v199_v3, %v198_v1  ;;  %v1375_v10 = vpack.c.bf16 %v185_v5, %v184_v4  ;;  %v271_v43 = vld [vmem:[%s2341_s1 + $0x788] sm:$0xff]  ;;  %v1419_v46 = vpack.c.bf16 %v239_v41, %v238_v40  ;;  %v222_v47 = vld [vmem:[%s2341_s1 + $0x600] sm:$0xff]  ;;  %v240_v52 = vld [vmem:[%s2341_s1 + $0x690] sm:$0xff] }
  0x44   :  { %1388 = vmatprep.subr.bf16.mxu1 %v1387_v14  ;;  %v1407_v14 = vpack.c.bf16 %v217_v7, %v216_v6  ;;  %v255_v51 = vld [vmem:[%s2341_s1 + $0x708] sm:$0xff]  ;;  %v241_v53 = vld [vmem:[%s2341_s1 + $0x698] sm:$0xff]  ;;  %v22_v56 = vld [vmem:[%s2342_s0 + $0x40] sm:$0xff] }
  0x45   :  { %491 = vmatmul.mubr.f32.vlgmr.msra.gmra.mrb[2].mxu0 %v18_v20  ;;  %v1377_v20 = vpack.c.bf16 %v169_v12, %v168_v11  ;;  %v273_v55 = vld [vmem:[%s2341_s1 + $0x798] sm:$0xff]  ;;  %v24_v58 = vld [vmem:[%s2342_s0 + $0x50] sm:$0xff]  ;;  %v243_v3 = vld [vmem:[%s2341_s1 + $0x6a8] sm:$0xff] }
  0x46   :  { %1358 = vmatpush3.bf16.msra.mxu0 %v1357_v21  ;;  %561 = vmatmul.mubr.f32.vlgmr.msra.gmra.mrb[2].mxu1 %v20_v22  ;;  %v1409_v21 = vpack.c.bf16 %v201_v15, %v200_v13  ;;  %v1379_v22 = vpack.c.bf16 %v187_v17, %v186_v16  ;;  %v256_v63 = vld [vmem:[%s2341_s1 + $0x710] sm:$0xff]  ;;  %v257_v1 = vld [vmem:[%s2341_s1 + $0x718] sm:$0xff]  ;;  %v274_v4 = vld [vmem:[%s2341_s1 + $0x7a0] sm:$0xff] }
  0x47   :  { %1390 = vmatpush3.bf16.msra.mxu1 %v1389_v23  ;;  %1360 = vmatprep.subr.bf16.mxu0 %v1359_v24  ;;  %v170_v23 = vld [vmem:[%s2341_s1 + $0x460] sm:$0xff]  ;;  %v171_v24 = vld [vmem:[%s2341_s1 + $0x468] sm:$0xff]  ;;  %v244_v16 = vld [vmem:[%s2341_s1 + $0x6b0] sm:$0xff] }
  0x48   :  { %1392 = vmatprep.subr.bf16.mxu1 %v1391_v28  ;;  %630 = vmatprep.mubr.f32.mxu0 %v23_v34  ;;  %v188_v28 = vld [vmem:[%s2341_s1 + $0x4f0] sm:$0xff]  ;;  %v1381_v32 = vpack.c.bf16 %v171_v24, %v170_v23  ;;  %v275_v5 = vld [vmem:[%s2341_s1 + $0x7a8] sm:$0xff]  ;;  %v226_v11 = vld [vmem:[%s2341_s1 + $0x620] sm:$0xff] }
  0x49   :  { %700 = vmatprep.mubr.f32.mxu1 %v25_v36  ;;  %v1383_v34 = vpack.c.bf16 %v189_v29, %v188_v28  ;;  %v173_v36 = vld [vmem:[%s2341_s1 + $0x478] sm:$0xff]  ;;  %v27_v6 = vld [vmem:[%s2342_s0 + $0x68] sm:$0xff]  ;;  %v258_v13 = vld [vmem:[%s2341_s1 + $0x720] sm:$0xff] }
  0x4a   :  { %1362 = vmatpush3.bf16.msra.mxu0 %v1361_v35  ;;  %v172_v35 = vld [vmem:[%s2341_s1 + $0x470] sm:$0xff]  ;;  %v227_v12 = vld [vmem:[%s2341_s1 + $0x628] sm:$0xff]  ;;  %v245_v17 = vld [vmem:[%s2341_s1 + $0x6b8] sm:$0xff] }
  0x4b   :  { %1394 = vmatpush3.bf16.msra.mxu1 %v1393_v37  ;;  %1364 = vmatprep.subr.bf16.mxu0 %v1363_v38  ;;  %v204_v37 = vld [vmem:[%s2341_s1 + $0x570] sm:$0xff]  ;;  %v1415_v38 = vpack.c.bf16 %v221_v31, %v220_v30  ;;  %v1385_v44 = vpack.c.bf16 %v173_v36, %v172_v35  ;;  %v259_v15 = vld [vmem:[%s2341_s1 + $0x728] sm:$0xff]  ;;  %v277_v19 = vld [vmem:[%s2341_s1 + $0x7b8] sm:$0xff] }
  0x4c   :  { %1396 = vmatprep.subr.bf16.mxu1 %v1395_v42  ;;  %v270_v42 = vld [vmem:[%s2341_s1 + $0x780] sm:$0xff]  ;;  %v1417_v45 = vpack.c.bf16 %v205_v39, %v204_v37  ;;  %v276_v18 = vld [vmem:[%s2341_s1 + $0x7b0] sm:$0xff]  ;;  %v229_v24 = vld [vmem:[%s2341_s1 + $0x638] sm:$0xff] }
  0x4d   :  { %v228_v23 = vld [vmem:[%s2341_s1 + $0x630] sm:$0xff]  ;;  %v261_v27 = vld [vmem:[%s2341_s1 + $0x738] sm:$0xff]  ;;  %v246_v28 = vld [vmem:[%s2341_s1 + $0x6c0] sm:$0xff] }
  0x4e   :  { %1366 = vmatpush3.bf16.msra.mxu0 %v1365_v48  ;;  %v223_v48 = vld [vmem:[%s2341_s1 + $0x608] sm:$0xff]  ;;  %v260_v25 = vld [vmem:[%s2341_s1 + $0x730] sm:$0xff]  ;;  %v278_v30 = vld [vmem:[%s2341_s1 + $0x7c0] sm:$0xff] }
  0x4f   :  { %1398 = vmatpush3.bf16.msra.mxu1 %v1397_v49  ;;  %1368 = vmatprep.subr.bf16.mxu0 %v1367_v50  ;;  %v254_v49 = vld [vmem:[%s2341_s1 + $0x700] sm:$0xff]  ;;  %v1451_v50 = vpack.c.bf16 %v271_v43, %v270_v42  ;;  %v1421_v57 = vpack.c.bf16 %v223_v48, %v222_v47  ;;  %v247_v29 = vld [vmem:[%s2341_s1 + $0x6c8] sm:$0xff]  ;;  %v248_v40 = vld [vmem:[%s2341_s1 + $0x6d0] sm:$0xff] }
  0x50   :  { %1400 = vmatprep.subr.bf16.mxu1 %v1399_v54  ;;  %v272_v54 = vld [vmem:[%s2341_s1 + $0x790] sm:$0xff]  ;;  %v1453_v59 = vpack.c.bf16 %v255_v51, %v254_v49  ;;  %v279_v31 = vld [vmem:[%s2341_s1 + $0x7c8] sm:$0xff]  ;;  %v230_v35 = vld [vmem:[%s2341_s1 + $0x640] sm:$0xff] }
  0x51   :  { %v1455_v0 = vpack.c.bf16 %v273_v55, %v272_v54  ;;  %v231_v36 = vld [vmem:[%s2341_s1 + $0x648] sm:$0xff]  ;;  %v262_v37 = vld [vmem:[%s2341_s1 + $0x740] sm:$0xff]  ;;  %v249_v41 = vld [vmem:[%s2341_s1 + $0x6d8] sm:$0xff] }
  0x52   :  { %1370 = vmatpush3.bf16.msra.mxu0 %v1369_v60  ;;  %v1423_v60 = vpack.c.bf16 %v241_v53, %v240_v52  ;;  %v263_v39 = vld [vmem:[%s2341_s1 + $0x748] sm:$0xff]  ;;  %v280_v42 = vld [vmem:[%s2341_s1 + $0x7d0] sm:$0xff]  ;;  %v281_v43 = vld [vmem:[%s2341_s1 + $0x7d8] sm:$0xff] }
  0x53   :  { %1402 = vmatpush3.bf16.msra.mxu1 %v1401_v61  ;;  %1372 = vmatprep.subr.bf16.mxu0 %v1371_v62  ;;  %v224_v61 = vld [vmem:[%s2341_s1 + $0x610] sm:$0xff]  ;;  %v225_v62 = vld [vmem:[%s2341_s1 + $0x618] sm:$0xff]  ;;  %v250_v52 = vld [vmem:[%s2341_s1 + $0x6e0] sm:$0xff] }
  0x54   :  { %1404 = vmatprep.subr.bf16.mxu1 %v1403_v2  ;;  %v242_v2 = vld [vmem:[%s2341_s1 + $0x6a0] sm:$0xff]  ;;  %v1425_v7 = vpack.c.bf16 %v225_v62, %v224_v61  ;;  %v232_v47 = vld [vmem:[%s2341_s1 + $0x650] sm:$0xff]  ;;  %v233_v48 = vld [vmem:[%s2341_s1 + $0x658] sm:$0xff] }
  0x55   :  { %v264_v49 = vld [vmem:[%s2341_s1 + $0x750] sm:$0xff]  ;;  %v265_v51 = vld [vmem:[%s2341_s1 + $0x758] sm:$0xff]  ;;  %v251_v53 = vld [vmem:[%s2341_s1 + $0x6e8] sm:$0xff] }
  0x56   :  { %1374 = vmatpush3.bf16.msra.mxu0 %v1373_v8  ;;  %v29_v8 = vld [vmem:[%s2342_s0 + $0x78] sm:$0xff]  ;;  %v282_v54 = vld [vmem:[%s2341_s1 + $0x7e0] sm:$0xff]  ;;  %v283_v55 = vld [vmem:[%s2341_s1 + $0x7e8] sm:$0xff] }
  0x57   :  { %1406 = vmatpush3.bf16.msra.mxu1 %v1405_v9  ;;  %1376 = vmatprep.subr.bf16.mxu0 %v1375_v10  ;;  %v1457_v9 = vpack.c.bf16 %v257_v1, %v256_v63  ;;  %v1427_v10 = vpack.c.bf16 %v243_v3, %v242_v2  ;;  %v266_v61 = vld [vmem:[%s2341_s1 + $0x760] sm:$0xff]  ;;  %v1475_v62 = vpack.c.bf16 %v283_v55, %v282_v54  ;;  %v267_v63 = vld [vmem:[%s2341_s1 + $0x768] sm:$0xff]  ;;  %v253_v1 = vld [vmem:[%s2341_s1 + $0x6f8] sm:$0xff] }
  0x58   :  { %1408 = vmatprep.subr.bf16.mxu1 %v1407_v14  ;;  %v1459_v14 = vpack.c.bf16 %v275_v5, %v274_v4  ;;  %v284_v2 = vld [vmem:[%s2341_s1 + $0x7f0] sm:$0xff]  ;;  %v285_v3 = vld [vmem:[%s2341_s1 + $0x7f8] sm:$0xff]  ;;  %v1477_v5 = vpack.c.bf16 %v267_v63, %v266_v61 }
  0x5a   :  { %1378 = vmatpush3.bf16.msra.mxu0 %v1377_v20  ;;  %v1429_v20 = vpack.c.bf16 %v227_v12, %v226_v11  ;;  %v269_v11 = vld [vmem:[%s2341_s1 + $0x778] sm:$0xff] }
  0x5b   :  { %1410 = vmatpush3.bf16.msra.mxu1 %v1409_v21  ;;  %1380 = vmatprep.subr.bf16.mxu0 %v1379_v22  ;;  %v1461_v21 = vpack.c.bf16 %v259_v15, %v258_v13  ;;  %v1431_v22 = vpack.c.bf16 %v245_v17, %v244_v16  ;;  %v28_v15 = vld [vmem:[%s2342_s0 + $0x70] sm:$0xff]  ;;  %v851_v16 = vld [vmem:[%s2343_s2] sm:$0xff]  ;;  %v852_v17 = vld [vmem:[%s2343_s2 + $0x8] sm:$0xff] }
  0x5c   :  { %1412 = vmatprep.subr.bf16.mxu1 %v1411_v26  ;;  %v1463_v26 = vpack.c.bf16 %v277_v19, %v276_v18  ;;  %v1484_v18 = vpack.c.bf16 %v852_v17, %v851_v16  ;;  %v1493_v19 = vmov 0.0|0.0  }
  0x5e   :  { %1382 = vmatpush3.bf16.msra.mxu0 %v1381_v32  ;;  %v1433_v32 = vpack.c.bf16 %v229_v24, %v228_v23 }
  0x5f   :  { %1414 = vmatpush3.bf16.msra.mxu1 %v1413_v33  ;;  %1384 = vmatprep.subr.bf16.mxu0 %v1383_v34  ;;  %v1465_v33 = vpack.c.bf16 %v261_v27, %v260_v25  ;;  %v1435_v34 = vpack.c.bf16 %v247_v29, %v246_v28 }
  0x60   :  { %1416 = vmatprep.subr.bf16.mxu1 %v1415_v38  ;;  %v1467_v38 = vpack.c.bf16 %v279_v31, %v278_v30 }
  0x62   :  { %1386 = vmatpush3.bf16.msra.mxu0 %v1385_v44  ;;  %v1437_v44 = vpack.c.bf16 %v231_v36, %v230_v35 }
  0x63   :  { %1418 = vmatpush3.bf16.msra.mxu1 %v1417_v45  ;;  %1420 = vmatprep.subr.bf16.mxu0 %v1419_v46  ;;  %v1469_v45 = vpack.c.bf16 %v263_v39, %v262_v37  ;;  %v1439_v46 = vpack.c.bf16 %v249_v41, %v248_v40 }
  0x64   :  { %1452 = vmatprep.subr.bf16.mxu1 %v1451_v50  ;;  %v1471_v50 = vpack.c.bf16 %v281_v43, %v280_v42 }
  0x65   :  { %631 = vmatmul.mubr.f32.vlgmr.msra.gmra.mrb[4].mxu0 %v22_v56  ;;  %v1441_v56 = vpack.c.bf16 %v233_v48, %v232_v47 }
  0x66   :  { %1422 = vmatpush3.bf16.msra.mxu0 %v1421_v57  ;;  %701 = vmatmul.mubr.f32.vlgmr.msra.gmra.mrb[4].mxu1 %v24_v58  ;;  %v1473_v57 = vpack.c.bf16 %v265_v51, %v264_v49  ;;  %v1443_v58 = vpack.c.bf16 %v251_v53, %v250_v52 }
  0x67   :  { %1454 = vmatpush3.bf16.msra.mxu1 %v1453_v59  ;;  %1424 = vmatprep.subr.bf16.mxu0 %v1423_v60  ;;  %v234_v59 = vld [vmem:[%s2341_s1 + $0x660] sm:$0xff]  ;;  %v235_v60 = vld [vmem:[%s2341_s1 + $0x668] sm:$0xff] }
  0x68   :  { %1456 = vmatprep.subr.bf16.mxu1 %v1455_v0  ;;  %770 = vmatprep.mubr.f32.mxu0 %v27_v6  ;;  %v252_v0 = vld [vmem:[%s2341_s1 + $0x6f0] sm:$0xff]  ;;  %v1445_v4 = vpack.c.bf16 %v235_v60, %v234_v59 }
  0x69   :  { %840 = vmatprep.mubr.f32.mxu1 %v29_v8  ;;  %v1447_v6 = vpack.c.bf16 %v253_v1, %v252_v0  ;;  %v237_v8 = vld [vmem:[%s2341_s1 + $0x678] sm:$0xff] }
  0x6a   :  { %1426 = vmatpush3.bf16.msra.mxu0 %v1425_v7  ;;  %v236_v7 = vld [vmem:[%s2341_s1 + $0x670] sm:$0xff] }
  0x6b   :  { %1458 = vmatpush3.bf16.msra.mxu1 %v1457_v9  ;;  %1428 = vmatprep.subr.bf16.mxu0 %v1427_v10  ;;  %v1479_v9 = vpack.c.bf16 %v285_v3, %v284_v2  ;;  %v268_v10 = vld [vmem:[%s2341_s1 + $0x770] sm:$0xff]  ;;  %v1449_v12 = vpack.c.bf16 %v237_v8, %v236_v7 }
  0x6c   :  { %1460 = vmatprep.subr.bf16.mxu1 %v1459_v14  ;;  %v1481_v13 = vpack.c.bf16 %v269_v11, %v268_v10  ;;  %v26_v14 = vld [vmem:[%s2342_s0 + $0x60] sm:$0xff] }
  0x6e   :  { %1430 = vmatpush3.bf16.msra.mxu0 %v1429_v20  ;;  %v1495_v20 = vmov 0.0  }
  0x6f   :  { %1462 = vmatpush3.bf16.msra.mxu1 %v1461_v21  ;;  %1432 = vmatprep.subr.bf16.mxu0 %v1431_v22 }
  0x70   :  { %1464 = vmatprep.subr.bf16.mxu1 %v1463_v26 }
  0x72   :  { %1434 = vmatpush3.bf16.msra.mxu0 %v1433_v32 }
  0x73   :  { %1466 = vmatpush3.bf16.msra.mxu1 %v1465_v33  ;;  %1436 = vmatprep.subr.bf16.mxu0 %v1435_v34 }
  0x74   :  { %1468 = vmatprep.subr.bf16.mxu1 %v1467_v38 }
  0x76   :  { %1438 = vmatpush3.bf16.msra.mxu0 %v1437_v44 }
  0x77   :  { %1470 = vmatpush3.bf16.msra.mxu1 %v1469_v45  ;;  %1440 = vmatprep.subr.bf16.mxu0 %v1439_v46 }
  0x78   :  { %1472 = vmatprep.subr.bf16.mxu1 %v1471_v50 }
  0x7a   :  { %1442 = vmatpush3.bf16.msra.mxu0 %v1441_v56 }
  0x7b   :  { %1474 = vmatpush3.bf16.msra.mxu1 %v1473_v57  ;;  %1444 = vmatprep.subr.bf16.mxu0 %v1443_v58 }
  0x7c   :  { %1476 = vmatprep.subr.bf16.mxu1 %v1475_v62 }
  0x7e   :  { %1446 = vmatpush3.bf16.msra.mxu0 %v1445_v4 }
  0x7f   :  { %1478 = vmatpush3.bf16.msra.mxu1 %v1477_v5  ;;  %1448 = vmatprep.subr.bf16.mxu0 %v1447_v6 }
  0x80   :  { %1480 = vmatprep.subr.bf16.mxu1 %v1479_v9 }
  0x82   :  { %1450 = vmatpush3.bf16.msra.mxu0 %v1449_v12 }
  0x83   :  { %1482 = vmatpush3.bf16.msra.mxu1 %v1481_v13  ;;  %1483 = vmatprep.subr.bf16.mxu0 %v1493_v19 }
  0x85   :  { %771 = vmatmul.mubr.f32.vlgmr.msra.gmra.mrb[6].mxu0 %v26_v14 }
  0x86   :  { %841 = vmatmul.mubr.f32.vlgmr.msra.gmra.mrb[6].mxu1 %v28_v15  ;;  %1485 = vmatpush3.bf16.msra.mxu0 %v1484_v18 }
  0x87   :  { %1224 = vmatprep.mubr.msk.f32.mxu0 %vm1494_vm0, %v1495_v20 }
  0xf8   :  { %v969_v21 = vpop.f32.mrb[0].mxu0 }
  0xf9   :  { %v1004_v22 = vpop.f32.mrb[0].mxu1  ;;  %v970_v23 = vpop.f32.mrb[1].mxu0 }
  0xfa   :  { %v971_v24 = vadd.f32 %v970_v23, %v969_v21  ;;  %v1005_v25 = vpop.f32.mrb[1].mxu1 }
  0xfb   :  { %v1006_v26 = vadd.f32 %v1005_v25, %v1004_v22 }
  0xfd   :  { %v423_v27 = vadd.f32 %v1006_v26, %v971_v24 }
 0x118   :  { %v1039_v28 = vpop.f32.mrb[2].mxu0 }
 0x119   :  { %v1040_v29 = vpop.f32.mrb[3].mxu0  ;;  %v1074_v30 = vpop.f32.mrb[2].mxu1 }
 0x11a   :  { %v1041_v31 = vadd.f32 %v1040_v29, %v1039_v28  ;;  %v1075_v32 = vpop.f32.mrb[3].mxu1 }
 0x11b   :  { %v1076_v33 = vadd.f32 %v1075_v32, %v1074_v30 }
 0x11c   :  { %v493_v34 = vadd.f32 %v1041_v31, %v423_v27 }
 0x11e   :  { %v563_v35 = vadd.f32 %v1076_v33, %v493_v34 }
 0x138   :  { %v1109_v36 = vpop.f32.mrb[4].mxu0 }
 0x139   :  { %v1110_v37 = vpop.f32.mrb[5].mxu0  ;;  %v1144_v38 = vpop.f32.mrb[4].mxu1 }
 0x13a   :  { %v1111_v39 = vadd.f32 %v1110_v37, %v1109_v36  ;;  %v1145_v40 = vpop.f32.mrb[5].mxu1 }
 0x13b   :  { %v1146_v41 = vadd.f32 %v1145_v40, %v1144_v38 }
 0x13c   :  { %v633_v42 = vadd.f32 %v1111_v39, %v563_v35 }
 0x13e   :  { %v703_v43 = vadd.f32 %v1146_v41, %v633_v42 }
 0x158   :  { %v1179_v44 = vpop.f32.mrb[6].mxu0 }
 0x159   :  { %v1180_v45 = vpop.f32.mrb[7].mxu0  ;;  %v1214_v46 = vpop.f32.mrb[6].mxu1 }
 0x15a   :  { %v1181_v47 = vadd.f32 %v1180_v45, %v1179_v44  ;;  %v1215_v48 = vpop.f32.mrb[7].mxu1 }
 0x15b   :  { %v1216_v49 = vadd.f32 %v1215_v48, %v1214_v46 }
 0x15c   :  { %v773_v50 = vadd.f32 %v1181_v47, %v703_v43 }
 0x15e   :  { %v843_v51 = vadd.f32 %v1216_v49, %v773_v50 }
 0x160   :  { %v846_v52 = vmul.f32 0.5, %v843_v51 }
 0x162   :  { %1489 = vtanh.f32 %v846_v52 }
 0x16c   :  { %v1490_v53 = vpop.eup %1489 }
 0x16d   :  { %v848_v54 = vadd.f32 1.0, %v1490_v53 }
 0x16f   :  { %v849_v55 = vmul.f32 0.5, %v848_v54 }
 0x171   :  { %v850_v56 = vmul.f32 %v849_v55, %v843_v51 }
 0x173   :  { %1225 = vmatmul.mubr.msk.f32.vlgmr.msra.gmra.mrb[8].mxu0 %vm853_vm1, %v850_v56 }
 0x246   :  { %v923_v57 = vpop.f32.mrb[8].mxu0 }
 0x247   :  { %v927_v58 = vmul.f32 0.5, %v923_v57  ;;  %v1226_v59 = vpop.f32.mrb[9].mxu0 }
 0x249   :  { %1491 = vtanh.f32 %v927_v58 }
 0x253   :  { %v1492_v60 = vpop.eup %1491 }
 0x254   :  { %v929_v61 = vadd.f32 1.0, %v1492_v60 }
 0x256   :  { %v930_v62 = vmul.f32 0.5, %v929_v61 }
 0x258   :  { %931 = vst.msk [vmem:[%s2344_s3] sm:$0xff] %vm853_vm1, %v930_v62 }

</bundles_post_ra>
